<compile_context>
chip_gen: v7x
topology: tpu7x:2x2x1
jax: 0.10.0
libtpu: 0.0.40
codegen_flags: <defaults>
</compile_context>

<pallas_src>
import functools
import math

import jax
import jax.numpy as jnp
from jax.experimental import pallas as pl
from jax.experimental.pallas import tpu as pltpu


def _rmsnorm_kernel(x_ref, scale_ref, *rest, d_x, eps, partial_size, has_bias):
    """One row tile: out = scale * x / (rms(x[..., :d_x]) + eps) (+ offset)."""
    if has_bias:
        offset_ref, o_ref = rest
    else:
        (o_ref,) = rest

    # Sum of squares accumulated in f32.  Cast at each use site (instead of
    # binding one big f32 temp and reusing it) so a full-tile f32 copy of x
    # doesn't have to stay live -> ~halves VMEM/vreg pressure for bf16/fp8.
    if partial_size is None:
        xs = x_ref[...].astype(jnp.float32)
        sum_sq = jnp.sum(xs * xs, axis=-1, keepdims=True)
    elif partial_size % 128 == 0:
        # lane-aligned partial RMSNorm: cheap static slice, no masking ops
        xs = x_ref[:, :partial_size].astype(jnp.float32)
        sum_sq = jnp.sum(xs * xs, axis=-1, keepdims=True)
    else:
        # non-aligned partial RMSNorm: static-slice the 128-aligned prefix and
        # mask only the boundary lane group (no full-tile iota/compare/select).
        aligned = (partial_size // 128) * 128
        hi = min(aligned + 128, x_ref.shape[1])
        xt = x_ref[:, aligned:hi].astype(jnp.float32)
        col = jax.lax.broadcasted_iota(jnp.int32, xt.shape, dimension=1)
        xt = jnp.where(col < (partial_size - aligned), xt, 0.0)
        sum_sq = jnp.sum(xt * xt, axis=-1, keepdims=True)
        if aligned > 0:
            xp = x_ref[:, :aligned].astype(jnp.float32)
            sum_sq = sum_sq + jnp.sum(xp * xp, axis=-1, keepdims=True)

    # matches torch: rms_x = norm_x * d_x ** (-0.5); x / (rms_x + eps)
    rms = jnp.sqrt(sum_sq) * (float(d_x) ** -0.5)      # (tile_rows, 1)
    # Exact per-row reciprocal (only tile_rows divides), broadcast-multiplied:
    # preserves x / (rms + eps) numerics, keeps the divide off the per-element
    # path.
    inv = 1.0 / (rms + eps)                            # (tile_rows, 1)
    out = x_ref[...].astype(jnp.float32) * inv
    out = out * scale_ref[...].astype(jnp.float32)
    if has_bias:
        out = out + offset_ref[...].astype(jnp.float32)
    o_ref[...] = out.astype(o_ref.dtype)


def _vmem_policy():
    """Generation-aware (vmem_limit_bytes, tile_budget_bytes)."""
    try:
        cap = int(pltpu.get_tpu_info().vmem_capacity_bytes)
    except Exception:
        cap = 64 << 20  # conservative fallback: smallest (v7x-class) VMEM
    # ~40 MiB limit on 64 MiB parts (v7x), ~96 MiB on 128 MiB parts (v5e/v6e).
    # Tile budget at half the limit leaves room for double-buffered in/out
    # tiles plus Mosaic internal scratch.
    limit = min(3 * cap // 4, cap - (24 << 20))
    limit = max(limit, 16 << 20)
    budget = limit // 2
    return limit, budget


def _pick_tile_rows(rows, d, itemsize, vmem_budget_bytes):
    """Row tile: large enough for the HBM roofline, small enough to fit the
    VMEM budget and to leave >= ~4 grid steps for pipelining / TC sharding."""
    # dtype-native sublane multiple: 8 rows (f32), 16 (bf16/f16), 32 (int8/fp8)
    sublane = max(8, 32 // max(1, itemsize))
    # Per-row footprint: double-buffered input + output tiles in the native
    # dtype (4 * itemsize bytes/elem) plus the in-kernel f32 temporaries
    # (~8 bytes/elem: normalized output + reduction operand).
    per_row_bytes = max(1, (4 * itemsize + 8) * d)
    max_rows_by_vmem = max(sublane, vmem_budget_bytes // per_row_bytes)
    # Guarantee multiple grid steps (~4) so DMAs of tile i+1 / writeback of
    # tile i-1 hide behind compute of tile i, and so v7x can split the
    # "parallel" row axis across its 2 TensorCores.
    quarter = -(-rows // 4)
    max_rows_by_grid = -(-quarter // sublane) * sublane
    tile = min(rows, max_rows_by_vmem, max_rows_by_grid)
    if tile < rows:
        # second-minor block dim must be a multiple of the sublane packing
        # unless it spans the full array extent
        tile = max(sublane, (tile // sublane) * sublane)
        tile = min(tile, rows)
    return tile


def rmsnorm(x, scale, offset=None, *, p=-1.0, eps=1e-8, tile_rows=None,
            vmem_budget_bytes=None):
    """RMSNorm over the last dim of x. x: (..., d), scale: (d,), offset: (d,) or None.

    Fast (lane-dense) path wants d to be a multiple of 128; smaller d still
    works but the output stores run on masked lanes.
    """
    d = x.shape[-1]
    assert scale.shape == (d,)
    if offset is not None:
        assert offset.shape == (d,)

    if p < 0.0 or p > 1.0:
        d_x = d
        partial_size = None
    else:
        d_x = int(d * p)
        partial_size = d_x
        assert d_x > 0, "partial RMSNorm with int(d * p) == 0 is degenerate"

    orig_shape = x.shape
    rows = math.prod(orig_shape[:-1]) if len(orig_shape) > 1 else 1
    x2 = x.reshape(rows, d)
    scale2 = scale.reshape(1, d)

    vmem_limit_bytes, default_budget = _vmem_policy()
    if vmem_budget_bytes is None:
        vmem_budget_bytes = default_budget

    if tile_rows is None:
        tile_rows = _pick_tile_rows(rows, d, jnp.dtype(x.dtype).itemsize,
                                    vmem_budget_bytes)
    tile_rows = min(tile_rows, rows)

    has_bias = offset is not None
    kernel = functools.partial(
        _rmsnorm_kernel, d_x=d_x, eps=eps, partial_size=partial_size,
        has_bias=has_bias,
    )

    in_specs = [
        pl.BlockSpec((tile_rows, d), lambda i: (i, 0)),
        pl.BlockSpec((1, d), lambda i: (0, 0)),   # scale: single resident block
    ]
    args = [x2, scale2]
    if has_bias:
        in_specs.append(pl.BlockSpec((1, d), lambda i: (0, 0)))
        args.append(offset.reshape(1, d))

    # No wrapper-side padding: Pallas masks the partial last tile.
    grid = (pl.cdiv(rows, tile_rows),)

    out = pl.pallas_call(
        kernel,
        out_shape=jax.ShapeDtypeStruct((rows, d), x.dtype),
        grid_spec=pltpu.PrefetchScalarGridSpec(
            num_scalar_prefetch=0,
            grid=grid,
            in_specs=in_specs,
            out_specs=pl.BlockSpec((tile_rows, d), lambda i: (i, 0)),
        ),
        compiler_params=pltpu.CompilerParams(
            dimension_semantics=("parallel",),
            vmem_limit_bytes=vmem_limit_bytes,
        ),
    )(*args)

    return out.reshape(orig_shape)


def rmsnorm_ref(x, scale, offset=None, *, p=-1.0, eps=1e-8):
    """Pure-JAX reference mirroring the PyTorch forward."""
    d = x.shape[-1]
    if p < 0.0 or p > 1.0:
        norm_x = jnp.linalg.norm(x, axis=-1, keepdims=True)
        d_x = d
    else:
        partial_size = int(d * p)
        norm_x = jnp.linalg.norm(x[..., :partial_size], axis=-1, keepdims=True)
        d_x = partial_size
    rms_x = norm_x * (float(d_x) ** -0.5)
    out = scale * (x / (rms_x + eps))
    if offset is not None:
        out = out + offset
    return out


if __name__ == "__main__":
    key = jax.random.PRNGKey(0)
    B, S, D = 2, 8, 32

    kx, ko = jax.random.split(key)
    x = jax.random.normal(kx, (B, S, D), dtype=jnp.float32)
    # Deterministic parameter init matching nn.Parameter(torch.ones(d)).
    scale = jnp.ones((D,), dtype=jnp.float32)
    # bias=False by default -> no offset parameter.

    out = rmsnorm(x, scale, p=-1.0, eps=1e-8)
    out = jax.block_until_ready(out)

    expected = rmsnorm_ref(x, scale, p=-1.0, eps=1e-8)
    assert out.shape == x.shape and out.dtype == x.dtype
    assert jnp.allclose(out, expected, atol=1e-5, rtol=1e-5)

    # Partial-RMSNorm path (p=0.5, non-128-aligned -> boundary-masked path).
    out_p = jax.block_until_ready(rmsnorm(x, scale, p=0.5, eps=1e-8))
    expected_p = rmsnorm_ref(x, scale, p=0.5, eps=1e-8)
    assert jnp.allclose(out_p, expected_p, atol=1e-5, rtol=1e-5)

    # bias=True path (offset initialized to zeros like the torch module, then
    # perturbed so the test actually exercises the add).
    offset = 0.1 * jax.random.normal(ko, (D,), dtype=jnp.float32)
    out_b = jax.block_until_ready(rmsnorm(x, scale, offset, p=-1.0, eps=1e-8))
    expected_b = rmsnorm_ref(x, scale, offset, p=-1.0, eps=1e-8)
    assert jnp.allclose(out_b, expected_b, atol=1e-5, rtol=1e-5)

    # Non-divisible row count (partial last tile, no wrapper pad).
    x_odd = jax.random.normal(kx, (3, 7, D), dtype=jnp.float32)
    out_odd = jax.block_until_ready(rmsnorm(x_odd, scale, tile_rows=8))
    assert jnp.allclose(out_odd, rmsnorm_ref(x_odd, scale), atol=1e-5, rtol=1e-5)

    # Auto tile-size path exercises the multi-step grid (>= ~4 steps).
    out_auto = jax.block_until_ready(rmsnorm(x_odd, scale))
    assert jnp.allclose(out_auto, rmsnorm_ref(x_odd, scale), atol=1e-5, rtol=1e-5)

    print("KERNEL_OK")
</pallas_src>

<mosaic_0001>
module attributes {stable_mosaic.version = 11 : i64} {
  func.func @_rmsnorm_kernel(%arg0: i32, %arg1: memref<8x32xf32, #tpu.memory_space<vmem>>, %arg2: memref<1x32xf32, #tpu.memory_space<vmem>>, %arg3: memref<8x32xf32, #tpu.memory_space<vmem>>) attributes {dimension_semantics = [#tpu.dimension_semantics<parallel>], iteration_bounds = array<i64: 2>, scalar_prefetch = 0 : i64, scratch_operands = 0 : i64, tpu.core_type = #tpu.core_type<tc>, window_params = [{transform_indices = @transform_0, window_bounds = array<i64: 8, 32>}, {pipeline_mode = #tpu.pipeline_mode<synchronous>, transform_indices = @transform_1, window_bounds = array<i64: 1, 32>}, {transform_indices = @transform_2, window_bounds = array<i64: 8, 32>}]} {
    %c0 = arith.constant 0 : index
    %c0_0 = arith.constant 0 : index
    %0 = vector.load %arg1[%c0, %c0_0] : memref<8x32xf32, #tpu.memory_space<vmem>>, vector<8x32xf32>
    %1 = arith.mulf %0, %0 : vector<8x32xf32>
    %cst = arith.constant dense<0.000000e+00> : vector<8xf32>
    %2 = vector.multi_reduction <add>, %1, %cst [1] : vector<8x32xf32> to vector<8xf32>
    %3 = vector.shape_cast %2 : vector<8xf32> to vector<8x1xf32>
    %4 = math.sqrt %3 : vector<8x1xf32>
    %cst_1 = arith.constant 0.176776692 : f32
    %5 = vector.broadcast %cst_1 : f32 to vector<8x1xf32>
    %6 = arith.mulf %4, %5 : vector<8x1xf32>
    %cst_2 = arith.constant 9.99999993E-9 : f32
    %7 = vector.broadcast %cst_2 : f32 to vector<8x1xf32>
    %8 = arith.addf %6, %7 : vector<8x1xf32>
    %cst_3 = arith.constant 1.000000e+00 : f32
    %9 = vector.broadcast %cst_3 : f32 to vector<8x1xf32>
    %10 = arith.divf %9, %8 : vector<8x1xf32>
    %c0_4 = arith.constant 0 : index
    %c0_5 = arith.constant 0 : index
    %11 = vector.load %arg1[%c0_4, %c0_5] : memref<8x32xf32, #tpu.memory_space<vmem>>, vector<8x32xf32>
    %12 = vector.broadcast %10 : vector<8x1xf32> to vector<8x32xf32>
    %13 = arith.mulf %11, %12 : vector<8x32xf32>
    %c0_6 = arith.constant 0 : index
    %c0_7 = arith.constant 0 : index
    %14 = vector.load %arg2[%c0_6, %c0_7] : memref<1x32xf32, #tpu.memory_space<vmem>>, vector<1x32xf32>
    %15 = vector.broadcast %14 : vector<1x32xf32> to vector<8x32xf32>
    %16 = arith.mulf %13, %15 : vector<8x32xf32>
    %c0_8 = arith.constant 0 : index
    %c0_9 = arith.constant 0 : index
    %17 = vector.load %arg3[%c0_8, %c0_9] : memref<8x32xf32, #tpu.memory_space<vmem>>, vector<8x32xf32>
    tpu.vector_store %arg3[%c0_8, %c0_9], %16 {strides = array<i32>} : memref<8x32xf32, #tpu.memory_space<vmem>>, vector<8x32xf32>,
    return
  }
  func.func @transform_0(%arg0: i32) -> (i32, i32) {
    %c0_i32 = arith.constant 0 : i32
    %c0_i32_0 = arith.constant 0 : i32
    return %arg0, %c0_i32 : i32, i32
  }
  func.func @transform_1(%arg0: i32) -> (i32, i32) {
    %c0_i32 = arith.constant 0 : i32
    %c0_i32_0 = arith.constant 0 : i32
    %c0_i32_1 = arith.constant 0 : i32
    return %c0_i32, %c0_i32_0 : i32, i32
  }
  func.func @transform_2(%arg0: i32) -> (i32, i32) {
    %c0_i32 = arith.constant 0 : i32
    %c0_i32_0 = arith.constant 0 : i32
    return %arg0, %c0_i32 : i32, i32
  }
}

</mosaic_0001>

<bundles_post_ra>
// kernel: tpu_custom_call.1
= control target key start
LH: loop header
LB: loop body
LE: loop exit
PB: predicated region body
PF: predicated region fallthrough
CT: control target
= control target key end

     0   :  { %7 = vsyncpa [#allocation3], 0  ;;  %s614_s0 = inlined_call_operand.hbm [shape: f32[16,32], index: 0, kind: input, shape index: {}]   ;;  %s615_s1 = inlined_call_operand.vmem [shape: f32[1,32], index: 1, kind: input, shape index: {}]   ;;  %s616_s2 = inlined_call_operand.hbm [shape: f32[16,32], index: 2, kind: output, shape index: {}]  }
   0x1   :  { %9 = vsyncpa [#allocation3 + $0x1], 0 }
   0x2   :  { %10 = vsyncpa [#allocation4], 0 }
   0x3   :  { %12 = vsyncpa [#allocation4 + $0x1], 0  ;;  %s448_s9 = smov 0   ;;  %s450_s10 = smov 0  }
   0x4   :  { %s452_s11 = smov 0   ;;  %s454_s12 = smov 0  }
   0x5 LB: > { %s469_s13 = sadd.s32 4294967295, %s429_s12   ;;  %s270_s14 = sadd.s32 4294967294, %s429_s12   ;;  %s429_s12 = sphi %s454_s12, %s631_s12   ;;  %s425_s11 = sphi %s452_s11, %s630_s11   ;;  %s421_s10 = sphi %s450_s10, %s629_s10   ;;  %s417_s9 = sphi %s448_s9, %s628_s9  }
   0x6   : > { %s473_s15 = sadd.s32 1, %s429_s12   ;;  %s25_s16 = sadd.s32 1, %s425_s11 }
   0x7   : > { %s22_s17 = ssub.s32 %s429_s12, %s473_s15  ;;  %p32_p0 = scmp.ne.s32.totalorder %s425_s11, %s421_s10 }
   0x8   : > { %p23_p1 = scmp.eq.s32.totalorder %s22_s17, 0  ;;  %p33_p2 = scmp.eq.s32.totalorder %s429_s12, 0 }
   0x9   : > { %p38_p3 = scmp.ne.s32.totalorder %s421_s10, %s417_s9  ;;  %p39_p4 = scmp.eq.s32.totalorder %s469_s13, 0 }
   0xa   : > { %s485_s18 = scalar_select %p23_p1, %s425_s11, %s25_s16  }
   0xb   : > { %p487_p5 = por %p33_p2, %p32_p0  ;;  %p491_p6 = por %p39_p4, %p38_p3 }
   0xc   : > { %p83_p7 = scmp.eq.s32.totalorder %s469_s13, 1  ;;  %p89_p8 = scmp.eq.s32.totalorder %s270_s14, 1 }
   0xd   : > { %p295_p10 = scmp.lt.s32.totalorder %s429_s12, 2  ;;  %s112_s23 = sand.u32 1, %s425_s11  }
   0xe   : > { %p498_p11 = por %p83_p7, %p32_p0  ;;  %p502_p12 = por %p89_p8, %p38_p3 }
   0xf   : > { %s274_s24 = sshll.u32 %s429_s12, 7  ;;  %s273_s25 = sshll.u32 %s112_s23, 3 }
  0x10   : > { %s620_s21 = scalar_select %p498_p11, 1, 0 }
  0x11   : > { %s621_s22 = scalar_select %p502_p12, 1, 0 }
  0x12   : > { %s511_s28 = scalar_lea.hbm %s614_s0, %s274_s24  ;;  %s116_s29 = scalar_lea.vmem [#allocation2], %s273_s25 }
  0x13   : > { %s123_s30 = sshll.u32 %s116_s29, 4  ;;  %p515_p13 = pnand %p295_p10, %p487_p5  ;;  %s519_s30 = int_to_ptr.vmem [resolvable:$true] %s123_s30 }
  0x14   : > { %s113_s4 = scalar_lea.sflag [#allocation3], %s112_s23  ;;  %s333_s5 = scalar_lea.hbm %s511_s28, 128 }
  0x15   : > { %p334_p2 = scmp.ne.s32.totalorder %s511_s28, %s333_s5  ;;  %p335_p3 = pneg %p515_p13 }
  0x16   : > { %s338_s8 = scalar_lea.hbm %s614_s0, 256  ;;  %p339_p5 = scmp.lt.u32.totalorder %s511_s28, %s614_s0 }
  0x17   : > { %p336_p4 = pnand %p335_p3, %p334_p2  ;;  %p340_p8 = scmp.lt.u32.totalorder %s338_s8, %s333_s5 }
  0x18   : > { %p342_p9 = scmp.lt.u32.totalorder %s333_s5, %s511_s28 }
  0x19   : > { %p337_p7 = pneg %p336_p4  ;;  %p341_p10 = por %p340_p8, %p339_p5 }
  0x1b   : > { %p343_p0 = por %p342_p9, %p341_p10 }
  0x1d   : > { %p344_p1 = pnand %p343_p0, %p337_p7 }
  0x1f   : > { %347 = shalt.err (!%p344_p1)
}
  0x20   : > { %s348_s17 = scalar_lea.vmem %s519_s30, 128  ;;  %s431_s19 = smov [#allocation2]  }
  0x21   : > { %p349_p2 = scmp.ne.s32.totalorder %s519_s30, %s348_s17  ;;  %s353_s23 = sshll.u32 %s431_s19, 4  ;;  %s354_s23 = int_to_ptr.vmem [resolvable:$false] %s353_s23 }
  0x22   : > { %s355_s24 = scalar_lea.vmem %s354_s23, 256  ;;  %p356_p11 = scmp.lt.s32.totalorder %s519_s30, %s354_s23 }
  0x23   : > { %p351_p4 = pnand %p349_p2, %p335_p3  ;;  %p357_p5 = scmp.lt.s32.totalorder %s355_s24, %s348_s17 }
  0x25   : > { %p352_p12 = pneg %p351_p4  ;;  %p358_p8 = por %p357_p5, %p356_p11 }
  0x27   : > { %p359_p9 = pnand %p358_p8, %p352_p12 }
  0x29   : > { %362 = shalt.err (!%p359_p9)
}
  0x2a   : > { %290 = dma.hbm_to_vmem [thread:$0]  (!%p515_p13), %s511_s28, 128, %s519_s30, %s113_s4  }
  0x2b   : > { %p623_p0 = scmp.lt.s32.totalorder %s429_s12, 3  ;;  %p624_p1 = scmp.ge.s32.totalorder %s429_s12, 1 }
  0x2d   : > { %p129_p3 = pnand %p624_p1, %p623_p0 }
  0x2e   : > { %s553_s25 = sand.u32 (!%p129_p3), 1, %s421_s10  }
  0x2f   : > { %132 = sbr.rel (%p129_p3) target bundleno = 249 (0xf9), region = 28  ;;  %s276_s26 = sshll.u32 (!%p129_p3), %s553_s25, 3 }
  0x30   : > { %s135_s27 = scalar_lea.sflag (!%p129_p3), [#allocation3], %s553_s25  ;;  %s138_s29 = scalar_lea.vmem (!%p129_p3), [#allocation2], %s276_s26 }
  0x36   : > { %408 = dma.done.wait (%p491_p6), %s135_s27, 128  }
  0x37   : > { %410 = vsyncadd (%p491_p6), %s135_s27, 4294967168  ;;  %v159_v0 = vld [vmem:[%s138_s29] sm:$0xff]  ;;  %vm161_vm0 = vcmask 261120   ;;  %s280_s30 = sshll.u32 %s469_s13, 7  ;;  %s158_s3 = scalar_lea.vmem [#allocation5], %s276_s26 }
  0x38   : > { %v160_v1 = vmul.f32 %v159_v0, %v159_v0  ;;  %v278_v12 = vld [vmem:[%s615_s1] ss:$0 sm:$0xff]  ;;  %s200_s4 = sshll.u32 %s158_s3, 4  ;;  %s569_s7 = scalar_lea.hbm %s616_s2, %s280_s30  ;;  %s571_s4 = int_to_ptr.vmem [resolvable:$true] %s200_s4 }
  0x39   : > { %s187_s8 = scalar_lea.sflag [#allocation4], %s553_s25  ;;  %s363_s14 = scalar_lea.vmem %s571_s4, 128 }
  0x3a   : > { %v162_v2 = vsel %vm161_vm0, %v160_v1, 0.0  ;;  %p364_p6 = scmp.ne.s32.totalorder %s571_s4, %s363_s14  ;;  %p625_p11 = scmp.ne.s32.totalorder %s620_s21, 0 }
  0x3b   : > { %163 = vadd.xlane.f32.xlu0 %v162_v2  ;;  %s432_s13 = smov [#allocation5]  }
  0x3c   : > { %p365_p12 = pnand %p364_p6, %p625_p11  ;;  %s367_s16 = sshll.u32 %s432_s13, 4  ;;  %s368_s16 = int_to_ptr.vmem [resolvable:$false] %s367_s16 }
  0x3d   : > { %s369_s17 = scalar_lea.vmem %s368_s16, 256  ;;  %p370_p7 = scmp.lt.s32.totalorder %s571_s4, %s368_s16 }
  0x3e   : > { %p366_p13 = pneg %p365_p12  ;;  %p371_p10 = scmp.lt.s32.totalorder %s369_s17, %s363_s14 }
  0x40   : > { %p372_p2 = por %p371_p10, %p370_p7 }
  0x42   : > { %p373_p4 = pnand %p372_p2, %p366_p13 }
  0xc8   : > { %v164_v3 = vpop.xlane.xlu0 %163 }
  0xc9   : > { %329 = vrsqrt.f32 %v164_v3  ;;  %vm167_vm1 = vcmp.eq.f32.partialorder %v164_v3, inf  ;;  %v170_v6 = vand.u32 2147483648, %v164_v3  ;;  %vm169_vm2 = vcmp.eq.f32.partialorder %v164_v3, 0.0 }
  0xd3   : > { %v330_v4 = vpop.eup %329 }
  0xd4   : > { %v166_v5 = vmul.f32 %v330_v4, %v164_v3 }
  0xd6   : > { %v168_v7 = vsel %vm167_vm1, %v164_v3, %v166_v5 }
  0xd7   : > { %v171_v8 = vsel %vm169_vm2, %v170_v6, %v168_v7 }
  0xd8   : > { %v172_v9 = vmul.f32 0.17677669, %v171_v8 }
  0xda   : > { %v173_v10 = vadd.f32 1e-08, %v172_v9 }
  0xdc   : > { %331 = vrcp.f32 %v173_v10 }
  0xe6   : > { %v332_v11 = vpop.eup %331 }
  0xe7   : > { %v176_v13 = vmul.f32 %v332_v11, %v159_v0 }
  0xe9   : > { %v184_v14 = vmul.f32 %v278_v12, %v176_v13 }
  0xeb   : > { %185 = vst.msk [vmem:[%s158_s3] sm:$0xff] %vm161_vm0, %v184_v14 }
  0xec   : > { %376 = shalt.err (!%p373_p4)
}
  0xed   : > { %s377_s19 = scalar_lea.hbm %s569_s7, 128  ;;  %s381_s25 = scalar_lea.hbm %s616_s2, 256 }
  0xee   : > { %p378_p5 = scmp.ne.s32.totalorder %s569_s7, %s377_s19  ;;  %p382_p0 = scmp.lt.u32.totalorder %s569_s7, %s616_s2 }
  0xef   : > { %p383_p1 = scmp.lt.u32.totalorder %s381_s25, %s377_s19  ;;  %p385_p6 = scmp.lt.u32.totalorder %s377_s19, %s569_s7 }
  0xf0   : > { %p379_p8 = pnand %p378_p5, %p625_p11 }
  0xf1   : > { %p384_p3 = por %p383_p1, %p382_p0 }
  0xf2   : > { %p380_p9 = pneg %p379_p8 }
  0xf3   : > { %p386_p12 = por %p385_p6, %p384_p3 }
  0xf5   : > { %p387_p13 = pnand %p386_p12, %p380_p9 }
  0xf7   : > { %390 = shalt.err (!%p387_p13)
}
  0xf8   : > { %285 = dma.vmem_to_hbm [thread:$0]  (%p625_p11), %s571_s4, 128, %s569_s7, %s187_s8  }
  0xf9 PF: > { %s212_s29 = sand.u32 1, %s417_s9   ;;  %p626_p7 = scmp.ne.s32.totalorder %s621_s22, 0 }
  0xfa   : > { %p627_p10 = scmp.ge.s32.totalorder %s429_s12, 2  ;;  %s213_s20 = scalar_lea.sflag [#allocation4], %s212_s29 }
  0xfc   : > { %p292_p2 = pnand %p627_p10, %p626_p7 }
  0xfe   : > { %412 = dma.done.wait (!%p292_p2), %s213_s20, 128  }
  0xff   : > { %414 = vsyncadd (!%p292_p2), %s213_s20, 4294967168  ;;  %p15_p4 = scmp.ge.s32.totalorder %s473_s15, 4   ;;  %s628_s9 = smov %s421_s10 }
 0x100   : > { %s629_s10 = smov %s425_s11  ;;  %s630_s11 = smov %s485_s18 }
 0x101   : > { %s631_s12 = smov %s473_s15  ;;  %17 = sbr.rel (!%p15_p4) target bundleno = 5 (0x5), region = 73 }
 0x108   :  { %218 = vsyncpa [#allocation3], 1 }
 0x109   :  { %220 = vsyncpa [#allocation3 + $0x1], 1 }
 0x10a   :  { %221 = vsyncpa [#allocation4], 1 }
 0x10b   :  { %223 = vsyncpa [#allocation4 + $0x1], 1 }

</bundles_post_ra>
